<compile_context>
chip_gen: v5e
topology: v5e:2x2
jax: 0.10.0
libtpu: 0.0.40
codegen_flags: <defaults>
</compile_context>

<pallas_src>
import functools

import jax
import jax.numpy as jnp
from jax.experimental import pallas as pl
from jax.experimental.pallas import tpu as pltpu


LANE = 128                              # TPU lane width (last dim of vreg tile)
SUBLANE = 8                             # f32 sublane granularity
MAX_TILE_ROWS = 512                     # up to 512*128 = 64K points per grid step
VMEM_BUDGET_BYTES = 24 * 1024 * 1024    # headroom under the scoped limit below
VMEM_LIMIT_BYTES = 32 * 1024 * 1024     # explicit scoped-VMEM limit (safe on all gens)


def _visualizer_kernel(pts_ref, xyz_ref, cnt_ref, *, batch_size):
    """Masked per-batch xyz selection for one point tile.

    pts_ref: (4, TR, 128) f32          row 0 = batch id, rows 1..3 = x, y, z
    xyz_ref: (batch_size, 3, TR, 128)  xyz where batch id == b, zeros elsewhere
    cnt_ref: (1, batch_size) i32 SMEM  per-tile point count for each batch
    """
    pts = pts_ref[...]                       # read the input tile once
    bid = pts[0]                             # (TR, 128)
    xyz = pts[1:4]                           # (3, TR, 128)
    zeros = jnp.zeros_like(xyz)
    for b in range(batch_size):              # static unroll; batch_size is small
        # float compare matches the original `point_bxyz[:, 0] == b`
        # (exact for integer-valued ids < 2^24).
        mask = bid == jnp.float32(b)         # (TR, 128)
        xyz_ref[b] = jnp.where(mask[None, :, :], xyz, zeros)
        cnt_ref[0, b] = jnp.sum(mask.astype(jnp.int32))


@functools.partial(jax.jit, static_argnames=("batch_size",))
def plotly_visualizer_forward(point_bxyz, batch_size):
    """point_bxyz: (N, 4) float32 [batch_id, x, y, z] per point.

    Returns:
      xyz_out: (batch_size, 3, N_pad) float32 -- xyz of points in batch b
               (column p == input point p), zeros elsewhere / padding.
      counts:  (batch_size,) int32 -- number of points in each batch.
    """
    n = point_bxyz.shape[0]

    # ---- lane/sublane-dense tiling of the point axis ----------------------
    rows_needed = pl.cdiv(n, LANE)
    rows_min = pl.cdiv(rows_needed, SUBLANE) * SUBLANE

    # VMEM guard: input block (4, TR, 128) + output block (B, 3, TR, 128),
    # both double-buffered by the auto-pipeline.
    bytes_per_row = (4 + 3 * batch_size) * LANE * 4 * 2
    budget_rows = max(
        SUBLANE, (VMEM_BUDGET_BYTES // bytes_per_row) // SUBLANE * SUBLANE
    )
    tile_rows = min(MAX_TILE_ROWS, budget_rows, rows_min)
    rows_total = pl.cdiv(rows_min, tile_rows) * tile_rows
    n_pad = rows_total * LANE
    n_tiles = rows_total // tile_rows

    # ---- (N, 4) -> (4, rows_total, 128): one transpose + one pad ----------
    # Pad value -1 never matches a valid batch id, so padded lanes mask to 0.
    pts = jnp.pad(
        point_bxyz.astype(jnp.float32).T,
        ((0, 0), (0, n_pad - n)),
        constant_values=-1.0,
    ).reshape(4, rows_total, LANE)

    kernel = functools.partial(_visualizer_kernel, batch_size=batch_size)

    xyz_out, tile_counts = pl.pallas_call(
        kernel,
        out_shape=(
            jax.ShapeDtypeStruct((batch_size, 3, rows_total, LANE), jnp.float32),
            jax.ShapeDtypeStruct((n_tiles, batch_size), jnp.int32),
        ),
        grid_spec=pltpu.PrefetchScalarGridSpec(
            num_scalar_prefetch=0,
            grid=(n_tiles,),
            in_specs=[
                pl.BlockSpec((4, tile_rows, LANE), lambda nt: (0, nt, 0)),
            ],
            out_specs=[
                pl.BlockSpec(
                    (batch_size, 3, tile_rows, LANE), lambda nt: (0, 0, nt, 0)
                ),
                pl.BlockSpec(
                    (1, batch_size),
                    lambda nt: (nt, 0),
                    memory_space=pltpu.MemorySpace.SMEM,
                ),
            ],
        ),
        compiler_params=pltpu.CompilerParams(
            dimension_semantics=("parallel",),
            vmem_limit_bytes=VMEM_LIMIT_BYTES,
        ),
    )(pts)

    counts = tile_counts.sum(axis=0)
    # (rows, 128) -> flat point axis: column p corresponds to input point p.
    xyz_flat = xyz_out.reshape(batch_size, 3, n_pad)
    return xyz_flat, counts


class PlotlyVisualizerPallas:
    """JAX/Pallas port of PlotlyVisualizer (compute portion only)."""

    def __init__(self, model_cfg=None, **kwargs):
        cfg = model_cfg or {}
        self.range = jnp.asarray(
            cfg.get("RANGE", [-100, -100, -100, 100, 100, 100]), dtype=jnp.float32
        )

    def forward(self, point_bxyz, batch_size):
        return plotly_visualizer_forward(point_bxyz, batch_size)


if __name__ == "__main__":
    key = jax.random.PRNGKey(0)
    k_xyz, k_bid = jax.random.split(key)

    # Small synthetic "batch_dict": N points, batch_size = 2
    N = 200
    batch_size = 2
    xyz = jax.random.uniform(k_xyz, (N, 3), jnp.float32, -100.0, 100.0)
    bids = jax.random.randint(k_bid, (N, 1), 0, batch_size).astype(jnp.float32)
    point_bxyz = jnp.concatenate([bids, xyz], axis=1)  # (N, 4)

    vis = PlotlyVisualizerPallas({"RANGE": [-100, -100, -100, 100, 100, 100]})
    xyz_out, counts = vis.forward(point_bxyz, batch_size)
    jax.block_until_ready((xyz_out, counts))

    # Correctness check vs. plain-JAX reference of the masked select.
    ok = True
    for b in range(batch_size):
        mask = point_bxyz[:, 0] == b
        ref_cnt = int(mask.sum())
        ok &= int(counts[b]) == ref_cnt
        ref_xyz = jnp.where(mask[None, :], point_bxyz[:, 1:4].T, 0.0)
        ok &= bool(jnp.allclose(xyz_out[b, :, :N], ref_xyz, atol=1e-6))
        ok &= bool(jnp.all(xyz_out[b, :, N:] == 0.0))
    assert ok, "mismatch vs reference"

    print("KERNEL_OK")
</pallas_src>

<mosaic_0001>
module attributes {stable_mosaic.version = 11 : i64} {
  func.func @_visualizer_kernel(%arg0: i32, %arg1: memref<4x8x128xf32, #tpu.memory_space<vmem>>, %arg2: memref<2x3x8x128xf32, #tpu.memory_space<vmem>>, %arg3: memref<1x2xi32, #tpu.memory_space<smem>>) attributes {dimension_semantics = [#tpu.dimension_semantics<parallel>], iteration_bounds = array<i64: 1>, scalar_prefetch = 0 : i64, scratch_operands = 0 : i64, tpu.core_type = #tpu.core_type<tc>, window_params = [{transform_indices = @transform_0, window_bounds = array<i64: 4, 8, 128>}, {transform_indices = @transform_1, window_bounds = array<i64: 2, 3, 8, 128>}, {transform_indices = @transform_2, window_bounds = array<i64: 1, 2>}]} {
    %c0 = arith.constant 0 : index
    %c0_0 = arith.constant 0 : index
    %c0_1 = arith.constant 0 : index
    %0 = vector.load %arg1[%c0, %c0_0, %c0_1] : memref<4x8x128xf32, #tpu.memory_space<vmem>>, vector<4x8x128xf32>
    %1 = vector.extract_strided_slice %0 {offsets = [0, 0, 0], sizes = [1, 8, 128], strides = [1, 1, 1]} : vector<4x8x128xf32> to vector<1x8x128xf32>
    %2 = vector.shape_cast %1 : vector<1x8x128xf32> to vector<8x128xf32>
    %3 = vector.extract_strided_slice %0 {offsets = [1, 0, 0], sizes = [3, 8, 128], strides = [1, 1, 1]} : vector<4x8x128xf32> to vector<3x8x128xf32>
    %cst = arith.constant 0.000000e+00 : f32
    %4 = vector.broadcast %cst : f32 to vector<3x8x128xf32>
    %cst_2 = arith.constant 0.000000e+00 : f32
    %5 = vector.broadcast %cst_2 : f32 to vector<8x128xf32>
    %6 = arith.cmpf oeq, %2, %5 : vector<8x128xf32>
    %7 = vector.shape_cast %6 : vector<8x128xi1> to vector<1x8x128xi1>
    %8 = vector.shape_cast %7 : vector<1x8x128xi1> to vector<1x8x128xi1>
    %9 = vector.broadcast %8 : vector<1x8x128xi1> to vector<3x8x128xi1>
    %10 = arith.select %9, %3, %4 : vector<3x8x128xi1>, vector<3x8x128xf32>
    %c0_3 = arith.constant 0 : index
    %c0_4 = arith.constant 0 : index
    %c0_5 = arith.constant 0 : index
    %c0_6 = arith.constant 0 : index
    %11 = vector.load %arg2[%c0_3, %c0_4, %c0_5, %c0_6] : memref<2x3x8x128xf32, #tpu.memory_space<vmem>>, vector<1x3x8x128xf32>
    %12 = vector.shape_cast %11 : vector<1x3x8x128xf32> to vector<3x8x128xf32>
    %13 = vector.shape_cast %10 : vector<3x8x128xf32> to vector<1x3x8x128xf32>
    tpu.vector_store %arg2[%c0_3, %c0_4, %c0_5, %c0_6], %13 {strides = array<i32>} : memref<2x3x8x128xf32, #tpu.memory_space<vmem>>, vector<1x3x8x128xf32>,
    %14 = arith.extui %6 : vector<8x128xi1> to vector<8x128xi32>
    %15 = vector.shape_cast %14 : vector<8x128xi32> to vector<1x8x128xi32>
    %cst_7 = arith.constant dense<0> : vector<1xi32>
    %16 = vector.multi_reduction <add>, %15, %cst_7 [1, 2] : vector<1x8x128xi32> to vector<1xi32>
    %17 = vector.shape_cast %16 : vector<1xi32> to vector<1x1x1xi32>
    %18 = vector.extract %17[0, 0, 0] : i32 from vector<1x1x1xi32>
    %c0_8 = arith.constant 0 : index
    %c0_9 = arith.constant 0 : index
    %19 = memref.load %arg3[%c0_8, %c0_9] : memref<1x2xi32, #tpu.memory_space<smem>>
    memref.store %18, %arg3[%c0_8, %c0_9] : memref<1x2xi32, #tpu.memory_space<smem>>
    %cst_10 = arith.constant 1.000000e+00 : f32
    %20 = vector.broadcast %cst_10 : f32 to vector<8x128xf32>
    %21 = arith.cmpf oeq, %2, %20 : vector<8x128xf32>
    %22 = vector.shape_cast %21 : vector<8x128xi1> to vector<1x8x128xi1>
    %23 = vector.shape_cast %22 : vector<1x8x128xi1> to vector<1x8x128xi1>
    %24 = vector.broadcast %23 : vector<1x8x128xi1> to vector<3x8x128xi1>
    %25 = arith.select %24, %3, %4 : vector<3x8x128xi1>, vector<3x8x128xf32>
    %c1 = arith.constant 1 : index
    %c0_11 = arith.constant 0 : index
    %c0_12 = arith.constant 0 : index
    %c0_13 = arith.constant 0 : index
    %26 = vector.load %arg2[%c1, %c0_11, %c0_12, %c0_13] : memref<2x3x8x128xf32, #tpu.memory_space<vmem>>, vector<1x3x8x128xf32>
    %27 = vector.shape_cast %26 : vector<1x3x8x128xf32> to vector<3x8x128xf32>
    %28 = vector.shape_cast %25 : vector<3x8x128xf32> to vector<1x3x8x128xf32>
    tpu.vector_store %arg2[%c1, %c0_11, %c0_12, %c0_13], %28 {strides = array<i32>} : memref<2x3x8x128xf32, #tpu.memory_space<vmem>>, vector<1x3x8x128xf32>,
    %29 = arith.extui %21 : vector<8x128xi1> to vector<8x128xi32>
    %30 = vector.shape_cast %29 : vector<8x128xi32> to vector<1x8x128xi32>
    %cst_14 = arith.constant dense<0> : vector<1xi32>
    %31 = vector.multi_reduction <add>, %30, %cst_14 [1, 2] : vector<1x8x128xi32> to vector<1xi32>
    %32 = vector.shape_cast %31 : vector<1xi32> to vector<1x1x1xi32>
    %33 = vector.extract %32[0, 0, 0] : i32 from vector<1x1x1xi32>
    %c0_15 = arith.constant 0 : index
    %c1_16 = arith.constant 1 : index
    %34 = memref.load %arg3[%c0_15, %c1_16] : memref<1x2xi32, #tpu.memory_space<smem>>
    memref.store %33, %arg3[%c0_15, %c1_16] : memref<1x2xi32, #tpu.memory_space<smem>>
    return
  }
  func.func @transform_0(%arg0: i32) -> (i32, i32, i32) {
    %c0_i32 = arith.constant 0 : i32
    %c0_i32_0 = arith.constant 0 : i32
    %c0_i32_1 = arith.constant 0 : i32
    return %c0_i32, %arg0, %c0_i32_0 : i32, i32, i32
  }
  func.func @transform_1(%arg0: i32) -> (i32, i32, i32, i32) {
    %c0_i32 = arith.constant 0 : i32
    %c0_i32_0 = arith.constant 0 : i32
    %c0_i32_1 = arith.constant 0 : i32
    %c0_i32_2 = arith.constant 0 : i32
    return %c0_i32, %c0_i32_0, %arg0, %c0_i32_1 : i32, i32, i32, i32
  }
  func.func @transform_2(%arg0: i32) -> (i32, i32) {
    %c0_i32 = arith.constant 0 : i32
    %c0_i32_0 = arith.constant 0 : i32
    return %arg0, %c0_i32 : i32, i32
  }
}

</mosaic_0001>

<bundles_post_ra>
// kernel: plotly_visualizer_forward.1
= control target key start
LH: loop header
LB: loop body
LE: loop exit
PB: predicated region body
PF: predicated region fallthrough
CT: control target
= control target key end

     0   :  { %s172_s0 = inlined_call_operand.vmem [shape: f32[4,8,128], index: 0, kind: input, shape index: {}]   ;;  %s173_s1 = inlined_call_operand.vmem [shape: f32[2,3,8,128], index: 1, kind: output, shape index: {0}]   ;;  %s174_s2 = inlined_call_operand.hbm [shape: s32[1,2], index: 2, kind: output, shape index: {1}]  }
   0x1   :  { %v11_v0 = vld [vmem:[%s172_s0] sm:$0xff]  ;;  %v12_v1 = vld [vmem:[%s172_s0 + $0x8] sm:$0xff]  ;;  %v13_v2 = vld [vmem:[%s172_s0 + $0x10] sm:$0xff] }
   0x2   :  { %v14_v3 = vld [vmem:[%s172_s0 + $0x18] sm:$0xff]  ;;  %vm15_vm0 = vcmp.eq.f32.partialorder %v11_v0, 0.0  ;;  %vm45_vm1 = vcmp.eq.f32.partialorder %v11_v0, 1.0 }
   0x3   :  { %8 = vsyncpa [#allocation3], 0  ;;  %v118_v4 = vmov 0   ;;  %v18_v6 = vsel %vm15_vm0, %v12_v1, 0.0  ;;  %v19_v7 = vsel %vm15_vm0, %v13_v2, 0.0  ;;  %v20_v8 = vsel %vm15_vm0, %v14_v3, 0.0 }
   0x4   :  { %v16_v5 = vsel %vm15_vm0, 1, %v118_v4  ;;  %21 = vst [vmem:[%s173_s1] sm:$0xff] %v18_v6  ;;  %v48_v11 = vsel %vm45_vm1, %v12_v1, 0.0  ;;  %v46_v12 = vsel %vm45_vm1, 1, %v118_v4  ;;  %v49_v13 = vsel %vm45_vm1, %v13_v2, 0.0  ;;  %s83_s30 = sshll.u32 %s174_s2, 4  ;;  %s119_s4 = smov [#allocation2]   ;;  %s84_s30 = int_to_ptr.hbm [resolvable:$true] %s83_s30 }
   0x5   :  { %v25_v9 = vshrl.u32 %v16_v5, 16  ;;  %v24_v10 = vand.u32 65535, %v16_v5  ;;  %22 = vst [vmem:[%s173_s1 + $0x8] sm:$0xff] %v19_v7  ;;  %v50_v16 = vsel %vm45_vm1, %v14_v3, 0.0  ;;  %v56_v17 = vshrl.u32 %v46_v12, 16 }
   0x6   :  { %23 = vst [vmem:[%s173_s1 + $0x10] sm:$0xff] %v20_v8  ;;  %v55_v18 = vand.u32 65535, %v46_v12 }
   0x7   :  { %v27_v14 = vcvt.s32.f32 %v25_v9  ;;  %v26_v15 = vcvt.s32.f32 %v24_v10  ;;  %95 = vst [vmem:[%s173_s1 + $0x18] sm:$0xff] %v48_v11  ;;  %v58_v19 = vcvt.s32.f32 %v56_v17 }
   0x8   :  { %96 = vst [vmem:[%s173_s1 + $0x20] sm:$0xff] %v49_v13  ;;  %v57_v20 = vcvt.s32.f32 %v55_v18 }
   0x9   :  { %30 = vadd.xlane.f32.xlu0 %v27_v14  ;;  %28 = vadd.xlane.f32.xlu1 %v26_v15  ;;  %97 = vst [vmem:[%s173_s1 + $0x28] sm:$0xff] %v50_v16 }
  0x11   :  { %61 = vadd.xlane.f32.xlu0 %v58_v19  ;;  %59 = vadd.xlane.f32.xlu1 %v57_v20 }
  0x7c   :  { %v31_v21 = vpop.xlane.xlu0 %30  ;;  %v29_v22 = vpop.xlane.xlu1 %28 }
  0x7d   :  { %v33_v23 = vcvt.f32.s32 %v31_v21  ;;  %v32_v24 = vcvt.f32.s32 %v29_v22 }
  0x7f   :  { %v34_v25 = vshll.u32 %v33_v23, 16 }
  0x81   :  { %v35_v26 = vadd.s32 %v34_v25, %v32_v24 }
  0x83   :  { %v36_v27 = vrot.slane %v35_v26, 4 }
  0x84   :  { %v62_v28 = vpop.xlane.xlu0 %61  ;;  %v60_v29 = vpop.xlane.xlu1 %59 }
  0x85   :  { %v64_v30 = vcvt.f32.s32 %v62_v28  ;;  %v63_v31 = vcvt.f32.s32 %v60_v29  ;;  %v37_v32 = vadd.s32 %v36_v27, %v35_v26 }
  0x87   :  { %v65_v33 = vshll.u32 %v64_v30, 16  ;;  %v38_v34 = vrot.slane %v37_v32, 2 }
  0x89   :  { %v66_v35 = vadd.s32 %v65_v33, %v63_v31  ;;  %v39_v36 = vadd.s32 %v38_v34, %v37_v32 }
  0x8b   :  { %v67_v37 = vrot.slane %v66_v35, 4  ;;  %v40_v38 = vrot.slane %v39_v36, 1 }
  0x8d   :  { %v68_v39 = vadd.s32 %v67_v37, %v66_v35  ;;  %v41_v40 = vadd.s32 %v40_v38, %v39_v36 }
  0x8f   :  { %98 = vpush %v41_v40  ;;  %v69_v41 = vrot.slane %v68_v39, 2 }
  0x91   :  { %v70_v42 = vadd.s32 %v69_v41, %v68_v39 }
  0x93   :  { %v71_v43 = vrot.slane %v70_v42, 1 }
  0x95   :  { %v72_v44 = vadd.s32 %v71_v43, %v70_v42 }
  0x97   :  { %100 = vpush %v72_v44 }
  0xc0   :  { %s99_s1 = spop %98 }
  0xc1   :  { %44 = sst [smem:[#allocation2]] %s99_s1 }
  0xc8   :  { %s101_s3 = spop %100 }
  0xc9   :  { %75 = sst [smem:[#allocation2 + $0x1]] %s101_s3 }
  0xca   :  { %86 = dma.smem_to_hbm %s119_s4, 16, %s84_s30, [#allocation3]  }
  0xcb   :  { %116 = dma.done.wait [#allocation3], 16  }
  0xcc   :  { %117 = vsyncadd [#allocation3], 4294967280 }
  0xcd   :  { %93 = sfence }
  0xce   :  { %94 = vsyncpa [#allocation3], 1 }

</bundles_post_ra>
